<compile_context>
chip_gen: v6e
topology: v6e:2x2x1
jax: 0.10.0
libtpu: 0.0.40
codegen_flags: <defaults>
</compile_context>

<pallas_src>
import functools
import math

import jax
import jax.numpy as jnp
import numpy as np
from jax.experimental import pallas as pl
from jax.experimental.pallas import tpu as pltpu


def _conv1d_lsh_kernel(x_ref, w_ref, b_ref, o_ref, *,
                       p_per_batch, halo_l, halo_r, c_in):
    # x_ref: (ROWS, lanes_in)    packed rows, ROWS = TB * P (whole batch elements)
    # w_ref: (r_feat_pad, 128)   fused block-Toeplitz conv weight (VMEM resident)
    # b_ref: (1, 128)            bias tiled PACK times             (VMEM resident)
    # o_ref: (ROWS, 128)         lane-dense packed output
    rows, lanes_in = x_ref.shape
    hl = halo_l * c_in
    hr = halo_r * c_in
    pad = w_ref.shape[0] - (lanes_in + hl + hr)

    x = x_ref[...]
    w = w_ref[...]                           # loaded once per grid step
    b = b_ref[...].astype(jnp.float32)

    # Row index within each batch element: cross-batch halo rows are zeroed,
    # which also realizes the conv's zero padding (no wrapper-side jnp.pad).
    row_in_batch = jax.lax.broadcasted_iota(jnp.int32, (rows, 1), 0) % p_per_batch

    # im2col layout per row: [ x (lanes_in) | prev_tail (hl) | next_head (hr) | 0-pad ]
    # Only the halo columns move through the row shift (slice before shift).
    # TODO(synk): swap the axis-0 concat shifts for pltpu.roll(axis=0) once the
    #             sublane-rotate lowering is validated for sub-8-row blocks.
    parts = [x]
    if hl > 0:
        tail = x[:, lanes_in - hl:]
        if rows > 1:
            prev_tail = jnp.concatenate(
                [jnp.zeros((1, hl), x.dtype), tail[:rows - 1, :]], axis=0)
        else:
            prev_tail = jnp.zeros((1, hl), x.dtype)
        prev_tail = jnp.where(row_in_batch == 0,
                              jnp.zeros_like(prev_tail), prev_tail)
        parts.append(prev_tail)
    if hr > 0:
        head = x[:, :hr]
        if rows > 1:
            next_head = jnp.concatenate(
                [head[1:, :], jnp.zeros((1, hr), x.dtype)], axis=0)
        else:
            next_head = jnp.zeros((1, hr), x.dtype)
        next_head = jnp.where(row_in_batch == p_per_batch - 1,
                              jnp.zeros_like(next_head), next_head)
        parts.append(next_head)
    if pad > 0:
        parts.append(jnp.zeros((rows, pad), x.dtype))
    xb = jnp.concatenate(parts, axis=-1) if len(parts) > 1 else parts[0]

    # Single fused MXU pass: M = ROWS, K = r_feat_pad (128-aligned), N = 128.
    # Cast to the weight's (compute) dtype right before the dot; f32 accumulate.
    acc = jnp.dot(xb.astype(w.dtype), w, preferred_element_type=jnp.float32)
    o_ref[...] = (acc + b).astype(o_ref.dtype)


def pack_conv1d_params(weight, bias, *, padding, lanes=128, compute_dtype=None):
    """Pack PyTorch-layout Conv1d params (weight (C_out,C_in,K), bias (C_out,))
    into the fused block-Toeplitz operands used by the Pallas kernel.

    Call ONCE per parameter set (outside the per-call hot path): the packing is
    a single einsum against a constant host-built one-hot selector.
    """
    C_out, C_in, K = weight.shape
    assert lanes % C_out == 0, "lane-dense packing needs C_out to divide 128"
    pack = lanes // C_out
    halo_l = int(padding)
    halo_r = K - 1 - halo_l
    assert 0 <= halo_l <= pack and 0 <= halo_r <= pack, "halo must fit one packed row"
    lanes_in = pack * C_in
    r_feat = lanes_in + (halo_l + halo_r) * C_in
    # Pad contraction depth to a multiple of 128: im2col rows become whole
    # 128-lane vregs and fill the 256-deep v6e/v7x MXU cleanly.
    r_feat_pad = ((r_feat + 127) // 128) * 128

    sel = np.zeros((r_feat_pad, pack, K, C_in), np.float32)
    for j in range(pack):                    # output position within a packed row
        for k in range(K):                   # conv tap
            rel = j + k - halo_l             # input position relative to this packed row
            for c in range(C_in):
                if 0 <= rel < pack:
                    d = rel * C_in + c                                        # current row
                elif rel < 0:
                    d = lanes_in + (rel + halo_l) * C_in + c                  # prev-row tail
                else:
                    d = lanes_in + halo_l * C_in + (rel - pack) * C_in + c    # next-row head
                sel[d, j, k, c] = 1.0

    if compute_dtype is None:
        compute_dtype = weight.dtype
    w_big = jnp.einsum("djkc,ock->djo", jnp.asarray(sel), weight.astype(jnp.float32))
    w_big = w_big.reshape(r_feat_pad, pack * C_out).astype(compute_dtype)
    b_big = jnp.tile(bias.astype(jnp.float32), pack).reshape(1, pack * C_out)
    return w_big, b_big


def conv1d_lsh_apply(x, w_big, b_big, *, c_out, kernel_size, padding,
                     target_block_bytes=2 << 20, vmem_limit_bytes=None):
    """x: (B, L, C_in) -> (B, L, C_out) with pre-packed conv params."""
    B, L, C_in = x.shape
    K = kernel_size
    halo_l = int(padding)
    halo_r = K - 1 - halo_l
    assert 2 * padding == K - 1, "packed kernel assumes a 'same' conv"
    assert 128 % c_out == 0, "lane-dense packing needs C_out to divide 128"
    pack = 128 // c_out
    assert L % pack == 0, "L must be a multiple of 128 // C_out"
    assert 0 <= halo_l <= pack and 0 <= halo_r <= pack

    P = L // pack
    lanes_in = pack * C_in              # 128 for the benchmark (C_in == C_out)
    lanes_out = pack * c_out            # == 128 (lane dense)
    r_feat_pad = ((lanes_in + (halo_l + halo_r) * C_in + 127) // 128) * 128
    assert w_big.shape == (r_feat_pad, lanes_out), "w_big does not match this config"
    assert b_big.shape == (1, lanes_out)

    rows_total = B * P
    # Contiguous (free) reshape into the lane-dense packed row layout.
    x_packed = x.reshape(rows_total, lanes_in)

    # Batch tiling: as many whole batch elements per grid step as the VMEM block
    # budget allows (double-buffered in+out blocks + ~128 KiB resident weight
    # stays under v5e's 16 MiB / v7x's 32 MiB scoped-VMEM defaults).
    elt = jnp.dtype(x.dtype).itemsize
    per_b_bytes = P * (lanes_in + lanes_out) * elt
    tb = max(1, int(target_block_bytes) // max(2 * per_b_bytes, 1))
    tb = min(B, tb)
    # v7x: when there is real work and B > 1, keep >= 2 grid steps so the
    # "parallel" batch axis feeds both TensorCores.  (Toy sizes stay 1 step.)
    if B > 1 and B * P >= 1024 and tb >= B:
        tb = pl.cdiv(B, 2)
    # Block second-minor dim must be a multiple of 8 unless it spans the array.
    if tb < B:
        step = 8 // math.gcd(P, 8)
        tb = min(B, ((tb + step - 1) // step) * step)
    TB = tb
    block_rows = TB * P
    grid = (pl.cdiv(B, TB),)

    kernel = functools.partial(_conv1d_lsh_kernel, p_per_batch=P,
                               halo_l=halo_l, halo_r=halo_r, c_in=C_in)

    out_packed = pl.pallas_call(
        kernel,
        out_shape=jax.ShapeDtypeStruct((rows_total, lanes_out), x.dtype),
        grid_spec=pltpu.PrefetchScalarGridSpec(
            num_scalar_prefetch=0,
            grid=grid,
            in_specs=[
                pl.BlockSpec((block_rows, lanes_in), lambda r: (r, 0)),
                # Tiny grid-invariant operands: VMEM resident, no per-step DMA.
                pl.BlockSpec(memory_space=pltpu.MemorySpace.VMEM),
                pl.BlockSpec(memory_space=pltpu.MemorySpace.VMEM),
            ],
            out_specs=pl.BlockSpec((block_rows, lanes_out), lambda r: (r, 0)),
        ),
        compiler_params=pltpu.CompilerParams(
            dimension_semantics=("parallel",),
            vmem_limit_bytes=vmem_limit_bytes),
    )(x_packed, w_big, b_big)

    # Contiguous (free) reshape back to the module's (B, L_out, C_out) layout.
    return out_packed.reshape(B, L, c_out)


def conv1d_for_lsh_sort(x, weight, bias, *, padding=1, stride=1, **kwargs):
    """Drop-in equivalent of the PyTorch module's forward.  Packs the weight per
    call; in a hot loop prefer pack_conv1d_params() once + conv1d_lsh_apply()."""
    assert stride == 1, "only stride=1 implemented"
    C_out, _, K = weight.shape
    w_big, b_big = pack_conv1d_params(weight, bias, padding=padding)
    return conv1d_lsh_apply(x, w_big, b_big, c_out=C_out, kernel_size=K,
                            padding=padding, **kwargs)


def _reference_conv1d(x, weight, bias, *, padding=1):
    # Pure-JAX reference reproducing the PyTorch module (NCL conv, then swap back).
    x_ncl = jnp.swapaxes(x, 1, 2)                     # (B, C_in, L)
    y = jax.lax.conv_general_dilated(
        x_ncl, weight,
        window_strides=(1,),
        padding=[(padding, padding)],
        dimension_numbers=("NCH", "OIH", "NCH"),
    )
    y = y + bias[None, :, None]
    return jnp.swapaxes(y, 1, 2)                      # (B, L_out, C_out)


if __name__ == "__main__":
    B, L, C_in, C_out, K, PAD = 2, 8, 32, 32, 3, 1

    key = jax.random.PRNGKey(0)
    kx, kw, kb = jax.random.split(key, 3)

    # Deterministic parameter init (PyTorch Conv1d shapes: weight (C_out, C_in, K)).
    fan_in = C_in * K
    bound = 1.0 / np.sqrt(fan_in)
    weight = jax.random.uniform(kw, (C_out, C_in, K), jnp.float32, -bound, bound)
    bias = jax.random.uniform(kb, (C_out,), jnp.float32, -bound, bound)

    x = jax.random.normal(kx, (B, L, C_in), jnp.float32)

    # Pack once (outside the hot path); jit only the kernel call.
    w_big, b_big = pack_conv1d_params(weight, bias, padding=PAD)
    fn = jax.jit(functools.partial(conv1d_lsh_apply,
                                   c_out=C_out, kernel_size=K, padding=PAD))
    out = jax.block_until_ready(fn(x, w_big, b_big))

    ref = _reference_conv1d(x, weight, bias, padding=PAD)
    np.testing.assert_allclose(np.asarray(out), np.asarray(ref),
                               rtol=1e-5, atol=1e-5)

    print("KERNEL_OK")
</pallas_src>

<mosaic_0001>
module attributes {stable_mosaic.version = 11 : i64} {
  func.func @_conv1d_lsh_kernel(%arg0: i32, %arg1: memref<4x128xf32, #tpu.memory_space<vmem>>, %arg2: memref<256x128xf32, #tpu.memory_space<vmem>>, %arg3: memref<1x128xf32, #tpu.memory_space<vmem>>, %arg4: memref<4x128xf32, #tpu.memory_space<vmem>>) attributes {dimension_semantics = [#tpu.dimension_semantics<parallel>], iteration_bounds = array<i64: 1>, scalar_prefetch = 0 : i64, scratch_operands = 0 : i64, tpu.core_type = #tpu.core_type<tc>, window_params = [{transform_indices = @transform_0, window_bounds = array<i64: 4, 128>}, {pipeline_mode = #tpu.pipeline_mode<synchronous>, transform_indices = @transform_1, window_bounds = array<i64: 256, 128>}, {pipeline_mode = #tpu.pipeline_mode<synchronous>, transform_indices = @transform_2, window_bounds = array<i64: 1, 128>}, {transform_indices = @transform_3, window_bounds = array<i64: 4, 128>}]} {
    %c0 = arith.constant 0 : index
    %c0_0 = arith.constant 0 : index
    %0 = vector.load %arg1[%c0, %c0_0] : memref<4x128xf32, #tpu.memory_space<vmem>>, vector<4x128xf32>
    %c0_1 = arith.constant 0 : index
    %c0_2 = arith.constant 0 : index
    %1 = vector.load %arg2[%c0_1, %c0_2] : memref<256x128xf32, #tpu.memory_space<vmem>>, vector<256x128xf32>
    %c0_3 = arith.constant 0 : index
    %c0_4 = arith.constant 0 : index
    %2 = vector.load %arg3[%c0_3, %c0_4] : memref<1x128xf32, #tpu.memory_space<vmem>>, vector<1x128xf32>
    %3 = tpu.iota {dimensions = array<i32: 0>} : vector<4x1xi32>
    %c2_i32 = arith.constant 2 : i32
    %c0_i32 = arith.constant 0 : i32
    %4 = arith.cmpi eq, %c2_i32, %c0_i32 : i32
    %c1_i32 = arith.constant 1 : i32
    %5 = arith.select %4, %c1_i32, %c2_i32 : i32
    %6 = vector.broadcast %5 : i32 to vector<4x1xi32>
    %7 = arith.remsi %3, %6 : vector<4x1xi32>
    %c0_i32_5 = arith.constant 0 : i32
    %8 = vector.broadcast %c0_i32_5 : i32 to vector<4x1xi32>
    %9 = arith.cmpi ne, %7, %8 : vector<4x1xi32>
    %c0_i32_6 = arith.constant 0 : i32
    %10 = vector.broadcast %c0_i32_6 : i32 to vector<4x1xi32>
    %11 = arith.cmpi slt, %7, %10 : vector<4x1xi32>
    %c0_i32_7 = arith.constant 0 : i32
    %12 = arith.cmpi slt, %5, %c0_i32_7 : i32
    %13 = vector.broadcast %12 : i1 to vector<4x1xi1>
    %14 = vector.broadcast %13 : vector<4x1xi1> to vector<4x1xi1>
    %15 = arith.xori %11, %14 : vector<4x1xi1>
    %16 = arith.andi %15, %9 : vector<4x1xi1>
    %17 = vector.broadcast %5 : i32 to vector<4x1xi32>
    %18 = arith.addi %7, %17 : vector<4x1xi32>
    %19 = arith.select %16, %18, %7 : vector<4x1xi1>, vector<4x1xi32>
    %20 = vector.extract_strided_slice %0 {offsets = [0, 96], sizes = [4, 32], strides = [1, 1]} : vector<4x128xf32> to vector<4x32xf32>
    %cst = arith.constant 0.000000e+00 : f32
    %21 = vector.broadcast %cst : f32 to vector<1x32xf32>
    %22 = vector.extract_strided_slice %20 {offsets = [0, 0], sizes = [3, 32], strides = [1, 1]} : vector<4x32xf32> to vector<3x32xf32>
    %23 = tpu.concatenate %21, %22 in 0 : vector<1x32xf32>, vector<3x32xf32> -> vector<4x32xf32>
    %c0_i32_8 = arith.constant 0 : i32
    %24 = vector.broadcast %c0_i32_8 : i32 to vector<4x1xi32>
    %25 = arith.cmpi eq, %19, %24 : vector<4x1xi32>
    %cst_9 = arith.constant 0.000000e+00 : f32
    %26 = vector.broadcast %cst_9 : f32 to vector<4x32xf32>
    %27 = vector.shape_cast %25 : vector<4x1xi1> to vector<4x1xi1>
    %28 = vector.broadcast %27 : vector<4x1xi1> to vector<4x32xi1>
    %29 = arith.select %28, %26, %23 : vector<4x32xi1>, vector<4x32xf32>
    %30 = vector.extract_strided_slice %0 {offsets = [0, 0], sizes = [4, 32], strides = [1, 1]} : vector<4x128xf32> to vector<4x32xf32>
    %31 = vector.extract_strided_slice %30 {offsets = [1, 0], sizes = [3, 32], strides = [1, 1]} : vector<4x32xf32> to vector<3x32xf32>
    %cst_10 = arith.constant 0.000000e+00 : f32
    %32 = vector.broadcast %cst_10 : f32 to vector<1x32xf32>
    %33 = tpu.concatenate %31, %32 in 0 : vector<3x32xf32>, vector<1x32xf32> -> vector<4x32xf32>
    %c1_i32_11 = arith.constant 1 : i32
    %34 = vector.broadcast %c1_i32_11 : i32 to vector<4x1xi32>
    %35 = arith.cmpi eq, %19, %34 : vector<4x1xi32>
    %cst_12 = arith.constant 0.000000e+00 : f32
    %36 = vector.broadcast %cst_12 : f32 to vector<4x32xf32>
    %37 = vector.shape_cast %35 : vector<4x1xi1> to vector<4x1xi1>
    %38 = vector.broadcast %37 : vector<4x1xi1> to vector<4x32xi1>
    %39 = arith.select %38, %36, %33 : vector<4x32xi1>, vector<4x32xf32>
    %cst_13 = arith.constant 0.000000e+00 : f32
    %40 = vector.broadcast %cst_13 : f32 to vector<4x64xf32>
    %41 = tpu.concatenate %0, %29, %39, %40 in 1 : vector<4x128xf32>, vector<4x32xf32>, vector<4x32xf32>, vector<4x64xf32> -> vector<4x256xf32>
    %cst_14 = arith.constant dense<0.000000e+00> : vector<4x128xf32>
    %42 = tpu.matmul %41, %1, %cst_14 {dimension_numbers = #tpu.dot_dimension_numbers<[1], [0], [0], [1], [0, 0, 1, 1], [], []>} : vector<4x256xf32>, vector<256x128xf32>, vector<4x128xf32> -> vector<4x128xf32>
    %43 = vector.broadcast %2 : vector<1x128xf32> to vector<4x128xf32>
    %44 = arith.addf %42, %43 : vector<4x128xf32>
    %c0_15 = arith.constant 0 : index
    %c0_16 = arith.constant 0 : index
    %45 = vector.load %arg4[%c0_15, %c0_16] : memref<4x128xf32, #tpu.memory_space<vmem>>, vector<4x128xf32>
    tpu.vector_store %arg4[%c0_15, %c0_16], %44 {strides = array<i32>} : memref<4x128xf32, #tpu.memory_space<vmem>>, vector<4x128xf32>,
    return
  }
  func.func @transform_0(%arg0: i32) -> (i32, i32) {
    %c0_i32 = arith.constant 0 : i32
    %c0_i32_0 = arith.constant 0 : i32
    return %arg0, %c0_i32 : i32, i32
  }
  func.func @transform_1(%arg0: i32) -> (i32, i32) {
    %c0_i32 = arith.constant 0 : i32
    %c0_i32_0 = arith.constant 0 : i32
    %c0_i32_1 = arith.constant 0 : i32
    return %c0_i32, %c0_i32_0 : i32, i32
  }
  func.func @transform_2(%arg0: i32) -> (i32, i32) {
    %c0_i32 = arith.constant 0 : i32
    %c0_i32_0 = arith.constant 0 : i32
    %c0_i32_1 = arith.constant 0 : i32
    return %c0_i32, %c0_i32_0 : i32, i32
  }
  func.func @transform_3(%arg0: i32) -> (i32, i32) {
    %c0_i32 = arith.constant 0 : i32
    %c0_i32_0 = arith.constant 0 : i32
    return %arg0, %c0_i32 : i32, i32
  }
}

</mosaic_0001>

<bundles_post_ra>
// kernel: conv1d_lsh_apply.1
= control target key start
LH: loop header
LB: loop body
LE: loop exit
PB: predicated region body
PF: predicated region fallthrough
CT: control target
= control target key end

     0   :  { %8 = vsyncpa [#allocation3], 0  ;;  %s248_s12 = smov [#allocation2]   ;;  %s302_s0 = inlined_call_operand.vmem [shape: f32[4,128], index: 0, kind: input, shape index: {}]   ;;  %s303_s1 = inlined_call_operand.hbm [shape: f32[256,128], index: 1, kind: input, shape index: {}]   ;;  %s304_s2 = inlined_call_operand.vmem [shape: f32[1,128], index: 2, kind: input, shape index: {}]   ;;  %s305_s3 = inlined_call_operand.vmem [shape: f32[4,128], index: 3, kind: output, shape index: {}]  }
   0x1   :  { %s16_s13 = sshll.u32 %s248_s12, 4  ;;  %s17_s13 = int_to_ptr.vmem [resolvable:$true] %s16_s13 }
   0x2   :  { %s234_s14 = scalar_lea.vmem %s17_s13, 4096  ;;  %p239_p1 = scmp.lt.s32.totalorder %s17_s13, %s17_s13 }
   0x3   :  { %p235_p0 = scmp.ne.s32.totalorder %s17_s13, %s234_s14  ;;  %p240_p2 = scmp.lt.s32.totalorder %s234_s14, %s234_s14 }
   0x5   :  { %p241_p3 = por %p240_p2, %p239_p1 }
   0x7   :  { %p242_p4 = pnand %p241_p3, %p235_p0 }
   0x9   :  { %245 = shalt.err (!%p242_p4)
}
   0xa   :  { %s249_s15 = smov 128   ;;  %s250_s16 = smov 8  }
   0xb   :  { %22 = dma.hbm_to_vmem [thread:$0]  %s303_s1, 4096, %s17_s13, [#allocation3], %s249_s15, %s249_s15, %s250_s16  }
   0xc   :  { %246 = dma.done.wait [#allocation3], 4096  }
   0xd   :  { %247 = vsyncadd [#allocation3], 4294963200  ;;  %v62_v0 = vlaneseq  ;;  %v281_v3 = vld [vmem:[%s302_s0] sm:$0xf]  ;;  %vm89_vm0 = vcmask 1042432   ;;  %v60_v4 = vld [vmem:[#allocation2 + $0xf8] sm:$0xff] }
   0xe   :  { %v44_v5 = vld [vmem:[#allocation2 + $0x78] sm:$0xff]  ;;  %v77_v6 = vrot.slane %v281_v3, 7  ;;  %v87_v7 = vrot.slane %v281_v3, 1  ;;  %187 = vmatprep.subr.mxu0 %v60_v4  ;;  %v59_v9 = vld [vmem:[#allocation2 + $0xf0] sm:$0xff]  ;;  %v58_v11 = vld [vmem:[#allocation2 + $0xe8] sm:$0xff]  ;;  %s251_s0 = smov 32  }
   0xf   :  { %v275_v1 = vshrl.u32 %v62_v0, 7  ;;  %v43_v10 = vld [vmem:[#allocation2 + $0x70] sm:$0xff]  ;;  %188 = vmatpush3.msra.mxu0 %v44_v5  ;;  %v42_v13 = vld [vmem:[#allocation2 + $0x68] sm:$0xff]  ;;  %v57_v15 = vld [vmem:[#allocation2 + $0xe0] sm:$0xff]  ;;  %vm81_vm2 = vcmask 1040384   ;;  %vm99_vm4 = vcmask 261120  }
  0x10   :  { %78 = vrot.lane.b32.xlu0 %v77_v6, %s251_s0  ;;  %v90_v12 = vsel %vm89_vm0, %v87_v7, 0.0  ;;  %189 = vmatprep.subr.mxu0 %v59_v9  ;;  %v41_v16 = vld [vmem:[#allocation2 + $0x60] sm:$0xff]  ;;  %v56_v17 = vld [vmem:[#allocation2 + $0xd8] sm:$0xff]  ;;  %v55_v19 = vld [vmem:[#allocation2 + $0xd0] sm:$0xff]  ;;  %vm101_vm5 = vcmask 523264  }
  0x11   :  { %v68_v2 = vand.u32 1, %v275_v1  ;;  %190 = vmatpush3.msra.mxu0 %v43_v10  ;;  %v40_v18 = vld [vmem:[#allocation2 + $0x58] sm:$0xff]  ;;  %v39_v20 = vld [vmem:[#allocation2 + $0x50] sm:$0xff]  ;;  %v54_v21 = vld [vmem:[#allocation2 + $0xc8] sm:$0xff] }
  0x12   :  { %191 = vmatprep.subr.mxu0 %v58_v11  ;;  %v38_v22 = vld [vmem:[#allocation2 + $0x48] sm:$0xff]  ;;  %v53_v23 = vld [vmem:[#allocation2 + $0xc0] sm:$0xff]  ;;  %v52_v25 = vld [vmem:[#allocation2 + $0xb8] sm:$0xff] }
  0x13   :  { %vm287_vm1 = vcmp.eq.s32.totalorder %v68_v2, 1  ;;  %192 = vmatpush3.msra.mxu0 %v42_v13  ;;  %v37_v24 = vld [vmem:[#allocation2 + $0x40] sm:$0xff]  ;;  %v36_v26 = vld [vmem:[#allocation2 + $0x38] sm:$0xff]  ;;  %v51_v27 = vld [vmem:[#allocation2 + $0xb0] sm:$0xff]  ;;  %vm83_vm3 = vcmp.eq.s32.totalorder %v68_v2, 0 }
  0x14   :  { %v94_v14 = vsel %vm287_vm1, 0.0, %v90_v12  ;;  %193 = vmatprep.subr.mxu0 %v57_v15  ;;  %v35_v28 = vld [vmem:[#allocation2 + $0x30] sm:$0xff]  ;;  %v50_v29 = vld [vmem:[#allocation2 + $0xa8] sm:$0xff]  ;;  %v49_v31 = vld [vmem:[#allocation2 + $0xa0] sm:$0xff] }
  0x15   :  { %96 = vrot.lane.b32.xlu0 %v94_v14, %s251_s0  ;;  %194 = vmatpush3.msra.mxu0 %v41_v16  ;;  %v34_v30 = vld [vmem:[#allocation2 + $0x28] sm:$0xff]  ;;  %v33_v32 = vld [vmem:[#allocation2 + $0x20] sm:$0xff]  ;;  %v48_v33 = vld [vmem:[#allocation2 + $0x98] sm:$0xff] }
  0x16   :  { %195 = vmatprep.subr.mxu0 %v56_v17  ;;  %v32_v34 = vld [vmem:[#allocation2 + $0x18] sm:$0xff]  ;;  %v47_v35 = vld [vmem:[#allocation2 + $0x90] sm:$0xff]  ;;  %v46_v37 = vld [vmem:[#allocation2 + $0x88] sm:$0xff] }
  0x17   :  { %196 = vmatpush3.msra.mxu0 %v40_v18  ;;  %v31_v36 = vld [vmem:[#allocation2 + $0x10] sm:$0xff]  ;;  %v30_v38 = vld [vmem:[#allocation2 + $0x8] sm:$0xff]  ;;  %v45_v39 = vld [vmem:[#allocation2 + $0x80] sm:$0xff] }
  0x18   :  { %197 = vmatprep.subr.mxu0 %v55_v19  ;;  %v29_v40 = vld [vmem:[#allocation2] sm:$0xff] }
  0x19   :  { %198 = vmatpush3.msra.mxu0 %v39_v20  ;;  %v185_v47 = vld [vmem:[%s304_s2] ss:$0 sm:$0xff] }
  0x1a   :  { %199 = vmatprep.subr.mxu0 %v54_v21 }
  0x1b   :  { %200 = vmatpush3.msra.mxu0 %v38_v22 }
  0x1c   :  { %201 = vmatprep.subr.mxu0 %v53_v23 }
  0x1d   :  { %202 = vmatpush3.msra.mxu0 %v37_v24 }
  0x1e   :  { %203 = vmatprep.subr.mxu0 %v52_v25 }
  0x1f   :  { %204 = vmatpush3.msra.mxu0 %v36_v26 }
  0x20   :  { %205 = vmatprep.subr.mxu0 %v51_v27 }
  0x21   :  { %206 = vmatpush3.msra.mxu0 %v35_v28 }
  0x22   :  { %207 = vmatprep.subr.mxu0 %v50_v29 }
  0x23   :  { %208 = vmatpush3.msra.mxu0 %v34_v30 }
  0x24   :  { %209 = vmatprep.subr.mxu0 %v49_v31 }
  0x25   :  { %210 = vmatpush3.msra.mxu0 %v33_v32 }
  0x26   :  { %211 = vmatprep.subr.mxu0 %v48_v33 }
  0x27   :  { %212 = vmatpush3.msra.mxu0 %v32_v34 }
  0x28   :  { %213 = vmatprep.subr.mxu0 %v47_v35 }
  0x29   :  { %214 = vmatpush3.msra.mxu0 %v31_v36 }
  0x2a   :  { %215 = vmatprep.subr.mxu0 %v46_v37 }
  0x2b   :  { %216 = vmatpush3.msra.mxu0 %v30_v38 }
  0x2c   :  { %217 = vmatprep.subr.mxu0 %v45_v39 }
  0x2d   :  { %218 = vmatpush3.msra.mxu0 %v29_v40 }
  0x82   :  { %v79_v41 = vpop.permute.xlu0 %78 }
  0x83   :  { %v82_v42 = vsel %vm81_vm2, 0.0, %v79_v41 }
  0x84   :  { %v86_v43 = vsel %vm83_vm3, 0.0, %v82_v42 }
  0x87   :  { %v97_v44 = vpop.permute.xlu0 %96 }
  0x88   :  { %v100_v45 = vsel %vm99_vm4, %v86_v43, %v97_v44 }
  0x89   :  { %186 = vmatprep.mubr.msk.f32.mxu0 %vm101_vm5, %v100_v45 }
  0x8a   :  { %174 = vmatmul.mubr.f32.vlgmr.msra.gmra.mxu0 %v281_v3 }
 0x14a   :  { %v219_v46 = vpop.f32.mrf.mxu0 }
 0x14c   :  { %v220_v48 = vpop.f32.mrf.mxu0 }
 0x14d   :  { %v221_v49 = vadd.f32 %v220_v48, %v219_v46 }
 0x14f   :  { %v176_v50 = vadd.f32 %v221_v49, %v185_v47 }
 0x151   :  { %179 = vst [vmem:[%s305_s3] sm:$0xf] %v176_v50 }
 0x152   :  { %184 = vsyncpa [#allocation3], 1 }

</bundles_post_ra>
